<compile_context>
chip_gen: v5e
topology: v5e:2x2
jax: 0.10.0
libtpu: 0.0.40
codegen_flags: <defaults>
</compile_context>

<pallas_src>
import functools

import jax
import jax.numpy as jnp
from jax import lax
from jax.experimental import pallas as pl
from jax.experimental.pallas import tpu as pltpu

_LANES = 128


def _sublane(dtype) -> int:
    itemsize = jnp.dtype(dtype).itemsize
    if itemsize >= 4:
        return 8
    if itemsize == 2:
        return 16
    return 32


def _num_tensorcores() -> int:
    """2 TensorCores per chip on v7x (grid 'parallel' shards across them);
    1 on v5e / v6e, so we skip the core axis there (no wasted duplicate DMA)."""
    try:
        kind = jax.devices()[0].device_kind.lower()
    except Exception:
        return 1
    if "v7" in kind:
        return 2
    return 1


def _make_sum_kernel(rows: int, tile_rows: int, tiles_per_core: int, acc_rows: int):
    groups = tile_rows // acc_rows

    def kernel(x_ref, out_ref, acc_ref):
        c = pl.program_id(0)
        i = pl.program_id(1)

        @pl.when(i == 0)
        def _():
            acc_ref[...] = jnp.zeros_like(acc_ref)

        base = (c * tiles_per_core + i) * tile_rows
        x = x_ref[...].astype(jnp.float32)

        # Ragged last tile (rows % tile_rows != 0) or the fully-masked
        # duplicate tile produced by index clamping on the second core.
        is_ragged = base + tile_rows > rows

        @pl.when(jnp.logical_not(is_ragged))
        def _():
            # Interior tile: pure cast + accumulate. acc_rows independent
            # sublane rows -> multiple parallel VALU add chains.
            acc_ref[...] += x.reshape(groups, acc_rows, _LANES).sum(axis=0)

        @pl.when(is_ragged)
        def _():
            row_ids = base + lax.broadcasted_iota(jnp.int32, (tile_rows, 1), 0)
            # Keep this a select (not a multiply) so padded garbage / NaNs
            # cannot propagate.
            xm = jnp.where(row_ids < rows, x, 0.0)
            acc_ref[...] += xm.reshape(groups, acc_rows, _LANES).sum(axis=0)

        @pl.when(i == pl.num_programs(1) - 1)
        def _():
            out_ref[0] = acc_ref[...]

    return kernel


@functools.partial(jax.jit, static_argnames=("reg", "block_bytes"))
def loss_forward(x_fake, *, reg: float = 1.0, block_bytes: int = 4 * 1024 * 1024):
    """reg * mean(compute(x_fake)) with identity compute, via a Pallas kernel."""
    n = x_fake.size
    itemsize = jnp.dtype(x_fake.dtype).itemsize
    sub = _sublane(x_fake.dtype)

    flat = x_fake.reshape(-1)  # no wrapper dtype cast; upcast happens in-kernel
    rem = n % _LANES
    if rem:
        # TODO(synk): this pad is one extra HBM pass for sizes that are not a
        # multiple of 128; a manual-DMA (pl.ANY) tail path would avoid it.
        flat = jnp.pad(flat, (0, _LANES - rem))
    rows = flat.size // _LANES

    # Tiny inputs: not worth a kernel launch.
    if rows < sub:
        return jnp.float32(reg) * jnp.mean(x_fake.astype(jnp.float32))

    # Row tile sized so each block is ~block_bytes (default 4 MiB), clamped to
    # the row count and rounded to the dtype's sublane packing.
    target_rows = max(sub, block_bytes // (_LANES * itemsize))
    tr = min(int(target_rows), rows)
    tr = max(sub, (tr // sub) * sub)

    # Accumulator height: widest of {64,32,16,8} that divides the tile.
    acc_rows = next(c for c in (64, 32, 16, 8) if tr % c == 0)

    num_tiles = -(-rows // tr)
    num_cores = _num_tensorcores()
    tiles_per_core = -(-num_tiles // num_cores)

    x2d = flat.reshape(rows, _LANES)

    cost = pl.CostEstimate(
        flops=n,
        transcendentals=0,
        bytes_accessed=rows * _LANES * itemsize + num_cores * acc_rows * _LANES * 4,
    )

    partials = pl.pallas_call(
        _make_sum_kernel(rows, tr, tiles_per_core, acc_rows),
        out_shape=jax.ShapeDtypeStruct((num_cores, acc_rows, _LANES), jnp.float32),
        grid_spec=pltpu.PrefetchScalarGridSpec(
            num_scalar_prefetch=0,
            grid=(num_cores, tiles_per_core),
            in_specs=[pl.BlockSpec(
                (tr, _LANES),
                lambda c, i: (jnp.minimum(c * tiles_per_core + i, num_tiles - 1), 0))],
            out_specs=pl.BlockSpec((1, acc_rows, _LANES), lambda c, i: (c, 0, 0)),
            scratch_shapes=[pltpu.VMEM((acc_rows, _LANES), jnp.float32)],
        ),
        compiler_params=pltpu.CompilerParams(
            dimension_semantics=("parallel", "arbitrary")),
        cost_estimate=cost,
    )(x2d)

    # Padded zeros contribute nothing to the sum; divide by the true count.
    total = jnp.sum(partials)
    return jnp.float32(reg) * total / jnp.float32(n)


def loss_success(x_fake, threshold: float = 10.0):
    """Mirrors the `.success` property: all(loss_componentwise <= threshold).

    Identity compute => componentwise loss is x_fake itself. Plain-JAX glue.
    """
    return jnp.all(x_fake <= threshold)


if __name__ == "__main__":
    key = jax.random.PRNGKey(0)
    # Small NCHW input consistent with the module's generic tensor interface.
    x = jax.random.normal(key, (2, 4, 16, 16), dtype=jnp.float32)

    reg = 1.0
    threshold = 10.0

    loss = loss_forward(x, reg=reg)
    loss = jax.block_until_ready(loss)

    # Reference check (plain JAX): reg * x.mean()
    ref = reg * jnp.mean(x)
    assert jnp.allclose(loss, ref, rtol=1e-5, atol=1e-6), (loss, ref)

    # Non-multiple-of-128 size exercises the padded path.
    x_odd = jax.random.normal(jax.random.PRNGKey(1), (3, 5, 7, 11), dtype=jnp.float32)
    loss_odd = jax.block_until_ready(loss_forward(x_odd, reg=0.5))
    ref_odd = 0.5 * jnp.mean(x_odd)
    assert jnp.allclose(loss_odd, ref_odd, rtol=1e-5, atol=1e-6), (loss_odd, ref_odd)

    _ = jax.block_until_ready(loss_success(x, threshold))

    print("KERNEL_OK")
</pallas_src>

<mosaic_0001>
module attributes {stable_mosaic.version = 11 : i64} {
  func.func @kernel(%arg0: i32, %arg1: i32, %arg2: memref<16x128xf32, #tpu.memory_space<vmem>>, %arg3: memref<1x16x128xf32, #tpu.memory_space<vmem>>, %arg4: memref<16x128xf32, #tpu.memory_space<vmem>>) attributes {dimension_semantics = [#tpu.dimension_semantics<parallel>, #tpu.dimension_semantics<arbitrary>], iteration_bounds = array<i64: 1, 1>, scalar_prefetch = 0 : i64, scratch_operands = 1 : i64, tpu.core_type = #tpu.core_type<tc>, window_params = [{transform_indices = @transform_0, window_bounds = array<i64: 16, 128>}, {transform_indices = @transform_1, window_bounds = array<i64: 1, 16, 128>}]} {
    %c0_i32 = arith.constant 0 : i32
    %0 = arith.cmpi eq, %arg1, %c0_i32 : i32
    %1 = arith.extui %0 : i1 to i32
    %c0_i32_0 = arith.constant 0 : i32
    %2 = arith.cmpi ne, %1, %c0_i32_0 : i32
    scf.if %2 {
      %cst = arith.constant 0.000000e+00 : f32
      %17 = vector.broadcast %cst : f32 to vector<16x128xf32>
      %c0_8 = arith.constant 0 : index
      %c0_9 = arith.constant 0 : index
      %18 = vector.load %arg4[%c0_8, %c0_9] : memref<16x128xf32, #tpu.memory_space<vmem>>, vector<16x128xf32>
      tpu.vector_store %arg4[%c0_8, %c0_9], %17 {strides = array<i32>} : memref<16x128xf32, #tpu.memory_space<vmem>>, vector<16x128xf32>,
    } else {
    }
    %c1_i32 = arith.constant 1 : i32
    %3 = arith.muli %arg0, %c1_i32 : i32
    %4 = arith.addi %3, %arg1 : i32
    %c16_i32 = arith.constant 16 : i32
    %5 = arith.muli %4, %c16_i32 : i32
    %c0 = arith.constant 0 : index
    %c0_1 = arith.constant 0 : index
    %6 = vector.load %arg2[%c0, %c0_1] : memref<16x128xf32, #tpu.memory_space<vmem>>, vector<16x128xf32>
    %c16_i32_2 = arith.constant 16 : i32
    %7 = arith.addi %5, %c16_i32_2 : i32
    %c16_i32_3 = arith.constant 16 : i32
    %8 = arith.cmpi sgt, %7, %c16_i32_3 : i32
    %true = arith.constant true
    %9 = arith.xori %8, %true : i1
    %10 = arith.extui %9 : i1 to i32
    %c0_i32_4 = arith.constant 0 : i32
    %11 = arith.cmpi ne, %10, %c0_i32_4 : i32
    scf.if %11 {
      %c0_8 = arith.constant 0 : index
      %c0_9 = arith.constant 0 : index
      %17 = vector.load %arg4[%c0_8, %c0_9] : memref<16x128xf32, #tpu.memory_space<vmem>>, vector<16x128xf32>
      %18 = vector.shape_cast %6 : vector<16x128xf32> to vector<1x16x128xf32>
      %cst = arith.constant dense<0.000000e+00> : vector<16x128xf32>
      %19 = vector.multi_reduction <add>, %18, %cst [0] : vector<1x16x128xf32> to vector<16x128xf32>
      %20 = arith.addf %17, %19 : vector<16x128xf32>
      %c0_10 = arith.constant 0 : index
      %c0_11 = arith.constant 0 : index
      %21 = vector.load %arg4[%c0_10, %c0_11] : memref<16x128xf32, #tpu.memory_space<vmem>>, vector<16x128xf32>
      tpu.vector_store %arg4[%c0_10, %c0_11], %20 {strides = array<i32>} : memref<16x128xf32, #tpu.memory_space<vmem>>, vector<16x128xf32>,
    } else {
    }
    %12 = arith.extui %8 : i1 to i32
    %c0_i32_5 = arith.constant 0 : i32
    %13 = arith.cmpi ne, %12, %c0_i32_5 : i32
    scf.if %13 {
      %17 = tpu.iota {dimensions = array<i32: 0>} : vector<16x1xi32>
      %18 = vector.broadcast %5 : i32 to vector<16x1xi32>
      %19 = arith.addi %18, %17 : vector<16x1xi32>
      %c16_i32_8 = arith.constant 16 : i32
      %20 = vector.broadcast %c16_i32_8 : i32 to vector<16x1xi32>
      %21 = arith.cmpi slt, %19, %20 : vector<16x1xi32>
      %cst = arith.constant 0.000000e+00 : f32
      %22 = vector.shape_cast %21 : vector<16x1xi1> to vector<16x1xi1>
      %23 = vector.broadcast %22 : vector<16x1xi1> to vector<16x128xi1>
      %24 = vector.broadcast %cst : f32 to vector<16x128xf32>
      %25 = arith.select %23, %6, %24 : vector<16x128xi1>, vector<16x128xf32>
      %c0_9 = arith.constant 0 : index
      %c0_10 = arith.constant 0 : index
      %26 = vector.load %arg4[%c0_9, %c0_10] : memref<16x128xf32, #tpu.memory_space<vmem>>, vector<16x128xf32>
      %27 = vector.shape_cast %25 : vector<16x128xf32> to vector<1x16x128xf32>
      %cst_11 = arith.constant dense<0.000000e+00> : vector<16x128xf32>
      %28 = vector.multi_reduction <add>, %27, %cst_11 [0] : vector<1x16x128xf32> to vector<16x128xf32>
      %29 = arith.addf %26, %28 : vector<16x128xf32>
      %c0_12 = arith.constant 0 : index
      %c0_13 = arith.constant 0 : index
      %30 = vector.load %arg4[%c0_12, %c0_13] : memref<16x128xf32, #tpu.memory_space<vmem>>, vector<16x128xf32>
      tpu.vector_store %arg4[%c0_12, %c0_13], %29 {strides = array<i32>} : memref<16x128xf32, #tpu.memory_space<vmem>>, vector<16x128xf32>,
    } else {
    }
    %c0_i32_6 = arith.constant 0 : i32
    %14 = arith.cmpi eq, %arg1, %c0_i32_6 : i32
    %15 = arith.extui %14 : i1 to i32
    %c0_i32_7 = arith.constant 0 : i32
    %16 = arith.cmpi ne, %15, %c0_i32_7 : i32
    scf.if %16 {
      %c0_8 = arith.constant 0 : index
      %c0_9 = arith.constant 0 : index
      %17 = vector.load %arg4[%c0_8, %c0_9] : memref<16x128xf32, #tpu.memory_space<vmem>>, vector<16x128xf32>
      %c0_10 = arith.constant 0 : index
      %c0_11 = arith.constant 0 : index
      %c0_12 = arith.constant 0 : index
      %18 = vector.load %arg3[%c0_10, %c0_11, %c0_12] : memref<1x16x128xf32, #tpu.memory_space<vmem>>, vector<1x16x128xf32>
      %19 = vector.shape_cast %18 : vector<1x16x128xf32> to vector<16x128xf32>
      %20 = vector.shape_cast %17 : vector<16x128xf32> to vector<1x16x128xf32>
      tpu.vector_store %arg3[%c0_10, %c0_11, %c0_12], %20 {strides = array<i32>} : memref<1x16x128xf32, #tpu.memory_space<vmem>>, vector<1x16x128xf32>,
    } else {
    }
    return
  }
  func.func @transform_0(%arg0: i32, %arg1: i32) -> (i32, i32) {
    %c1_i32 = arith.constant 1 : i32
    %0 = arith.muli %arg0, %c1_i32 : i32
    %1 = arith.addi %0, %arg1 : i32
    %c0_i32 = arith.constant 0 : i32
    %2 = arith.minsi %1, %c0_i32 : i32
    %c0_i32_0 = arith.constant 0 : i32
    %c0_i32_1 = arith.constant 0 : i32
    return %2, %c0_i32_0 : i32, i32
  }
  func.func @transform_1(%arg0: i32, %arg1: i32) -> (i32, i32, i32) {
    %c0_i32 = arith.constant 0 : i32
    %c0_i32_0 = arith.constant 0 : i32
    %c0_i32_1 = arith.constant 0 : i32
    return %arg0, %c0_i32, %c0_i32_0 : i32, i32, i32
  }
}

</mosaic_0001>

<bundles_post_ra>
// kernel: loss_forward.1
= control target key start
LH: loop header
LB: loop body
LE: loop exit
PB: predicated region body
PF: predicated region fallthrough
CT: control target
= control target key end

     0   :  { %s128_s0 = inlined_call_operand.vmem [shape: f32[16,128], index: 0, kind: input, shape index: {}]   ;;  %s129_s1 = inlined_call_operand.vmem [shape: f32[1,16,128], index: 1, kind: output, shape index: {}]  }
   0x1   :  { %v48_v0 = vld [vmem:[%s128_s0] sm:$0xff]  ;;  %v49_v1 = vld [vmem:[%s128_s0 + $0x8] sm:$0xff] }
   0x2   :  { %94 = vst [vmem:[%s129_s1] sm:$0xff] %v48_v0 }
   0x3   :  { %95 = vst [vmem:[%s129_s1 + $0x8] sm:$0xff] %v49_v1 }

</bundles_post_ra>
